<compile_context>
chip_gen: v7x
topology: tpu7x:2x2x1
jax: 0.10.0
libtpu: 0.0.40
codegen_flags: <defaults>
</compile_context>

<pallas_src>
import jax
import jax.numpy as jnp
from jax.experimental import pallas as pl
from jax.experimental.pallas import tpu as pltpu

_MiB = 1024 * 1024


# ---------------------------------------------------------------------------
# Kernels
# ---------------------------------------------------------------------------
def _probe_kernel_resident(x_ref, w_ref, b_ref, o_ref):
    """out = x @ W_eff + b  with the whole W_eff resident in VMEM.

    x_ref: (tm, K)    row tile of x (native flattened layout)
    w_ref: (K, Npad)  effective projection weight (fetched once)
    b_ref: (1, Npad)  bias (lane-padded)
    o_ref: (tm, Npad) output rows
    """
    o_ref[...] = (
        jnp.dot(x_ref[...], w_ref[...], preferred_element_type=jnp.float32)
        + b_ref[...]
    ).astype(o_ref.dtype)


def _probe_kernel_ktiled(x_ref, w_ref, b_ref, o_ref, acc_ref):
    """Fallback K-tiled GEMM with an f32 VMEM accumulator (very large K only)."""
    k = pl.program_id(1)

    @pl.when(k == 0)
    def _():
        acc_ref[...] = jnp.zeros_like(acc_ref)

    acc_ref[...] += jnp.dot(x_ref[...], w_ref[...],
                            preferred_element_type=jnp.float32)

    @pl.when(k == pl.num_programs(1) - 1)
    def _():
        o_ref[...] = (acc_ref[...] + b_ref[...]).astype(o_ref.dtype)


# ---------------------------------------------------------------------------
# Tiling / VMEM helpers
# ---------------------------------------------------------------------------
def _vmem_budget():
    """Generation-aware operand budget and scoped-VMEM limit (bytes)."""
    try:
        cap = pltpu.get_tpu_info().vmem_capacity_bytes
    except Exception:
        cap = 64 * _MiB  # conservative (v7x has 64 MiB / TC)
    budget = max(16 * _MiB, min(cap // 2 - 4 * _MiB, 56 * _MiB))  # v7x:28, v5e/v6e:56
    vmem_limit = min(budget + 4 * _MiB, cap - 8 * _MiB)
    return budget, vmem_limit


def _projection_gemm(x_flat, w_eff, b_pad, *, out_dtype, tm_hint=1024):
    """out[M, Npad] = x_flat[M, K] @ w_eff[K, Npad] + b_pad[1, Npad]."""
    M, K = x_flat.shape
    Npad = w_eff.shape[1]
    x_isz = x_flat.dtype.itemsize
    w_isz = w_eff.dtype.itemsize
    o_isz = jnp.dtype(out_dtype).itemsize

    budget, vmem_limit = _vmem_budget()

    # Row tile: large for DMA efficiency / per-step overhead amortization, but
    # clamped so the "parallel" row axis has >= 2 tiles (v7x has 2 TCs/chip).
    tm = max(8, min(tm_hint, pl.cdiv(M, 8) * 8, max(8, pl.cdiv(M, 16) * 8)))

    def resident_need(t):
        return (2 * t * K * x_isz          # x row tiles (double-buffered)
                + 2 * K * Npad * w_isz     # resident weight (budget 2 buffers)
                + 2 * Npad * 4             # bias
                + 2 * t * Npad * o_isz)    # output tiles (double-buffered)

    if resident_need(8) <= budget:
        # --- Resident-weight path: 1-D grid, W_eff fetched once, no accumulator.
        while tm > 8 and resident_need(tm) > budget:
            tm = max(8, ((tm // 2) + 7) // 8 * 8)
        grid = (pl.cdiv(M, tm),)
        cost = pl.CostEstimate(
            flops=2 * M * K * Npad,
            transcendentals=0,
            bytes_accessed=(M * K * x_isz + K * Npad * w_isz
                            + Npad * 4 + M * Npad * o_isz),
        )
        return pl.pallas_call(
            _probe_kernel_resident,
            out_shape=jax.ShapeDtypeStruct((M, Npad), out_dtype),
            grid=grid,
            in_specs=[
                pl.BlockSpec((tm, K), lambda i: (i, 0)),     # x row tile
                pl.BlockSpec((K, Npad), lambda i: (0, 0)),   # resident weight
                pl.BlockSpec((1, Npad), lambda i: (0, 0)),   # bias
            ],
            out_specs=pl.BlockSpec((tm, Npad), lambda i: (i, 0)),
            compiler_params=pltpu.CompilerParams(
                dimension_semantics=("parallel",),
                vmem_limit_bytes=vmem_limit,
            ),
            cost_estimate=cost,
        )(x_flat, w_eff, b_pad)

    # --- Fallback: K-tiled grid + f32 accumulator (only for very large K). ---
    Kpad = pl.cdiv(K, 512) * 512
    if Kpad != K:
        x_flat = jnp.pad(x_flat, ((0, 0), (0, Kpad - K)))
        w_eff = jnp.pad(w_eff, ((0, Kpad - K), (0, 0)))
        K = Kpad
    tk = next(t for t in (2048, 1536, 1024, 512) if K % t == 0)

    def ktiled_need(t):
        return (2 * t * tk * x_isz + 2 * tk * Npad * w_isz + 2 * Npad * 4
                + t * Npad * 4 + 2 * t * Npad * o_isz)

    while tm > 8 and ktiled_need(tm) > budget:
        tm = max(8, ((tm // 2) + 7) // 8 * 8)
    grid = (pl.cdiv(M, tm), K // tk)
    cost = pl.CostEstimate(
        flops=2 * M * K * Npad,
        transcendentals=0,
        bytes_accessed=(M * K * x_isz + grid[0] * K * Npad * w_isz
                        + Npad * 4 + M * Npad * o_isz),
    )
    return pl.pallas_call(
        _probe_kernel_ktiled,
        out_shape=jax.ShapeDtypeStruct((M, Npad), out_dtype),
        grid=grid,
        in_specs=[
            pl.BlockSpec((tm, tk), lambda i, k: (i, k)),
            pl.BlockSpec((tk, Npad), lambda i, k: (k, 0)),
            pl.BlockSpec((1, Npad), lambda i, k: (0, 0)),
        ],
        out_specs=pl.BlockSpec((tm, Npad), lambda i, k: (i, 0)),
        scratch_shapes=[pltpu.VMEM((tm, Npad), jnp.float32)],
        compiler_params=pltpu.CompilerParams(
            dimension_semantics=("parallel", "arbitrary"),
            vmem_limit_bytes=vmem_limit,
        ),
        cost_estimate=cost,
    )(x_flat, w_eff, b_pad)


# ---------------------------------------------------------------------------
# Probe forward
# ---------------------------------------------------------------------------
def probe_forward(x, lw, W, b, *, weight_sum=True, mxu_dtype=None, tm=1024):
    """x: (B, T, D, L), lw: (L,), W: (N, D), b: (N,). Returns (wx, weights).

    mxu_dtype: optionally cast GEMM operands (e.g. jnp.bfloat16 on v5e) while
    keeping f32 accumulation; default None keeps the input dtype.
    """
    B, T, D, L = x.shape
    N = W.shape[0]
    M = B * T

    weights = jax.nn.softmax(lw.astype(jnp.float32), axis=0)      # (L,)

    if weight_sum:
        # Fold the layer mix into the projection weight so x is consumed in its
        # native (B,T,D,L) layout:  W_eff[d*L + l, n] = mix[l] * W[n, d].
        mix = weights.astype(jnp.float32)
        K = D * L
        w_eff = (W.astype(jnp.float32).T[:, None, :] * mix[None, :, None]).reshape(K, N)
        x_flat = x.reshape(M, K)                                   # free reshape
    else:
        # Exact x[:, :, :, -1] semantics: slice the last layer, K = D GEMM.
        K = D
        w_eff = W.astype(jnp.float32).T                            # (D, N)
        x_flat = x[..., -1].reshape(M, K)

    # Lane-dense output padding; multiple of 256 once N exceeds 128 (v6e/v7x
    # MXU output tile is 256 wide).
    Npad = 128 if N <= 128 else pl.cdiv(N, 256) * 256
    w_eff = jnp.pad(w_eff, ((0, 0), (0, Npad - N)))
    b_pad = jnp.pad(b.astype(jnp.float32).reshape(1, N), ((0, 0), (0, Npad - N)))

    if mxu_dtype is not None:
        x_flat = x_flat.astype(mxu_dtype)
        w_eff = w_eff.astype(mxu_dtype)

    out = _projection_gemm(x_flat, w_eff, b_pad, out_dtype=x.dtype, tm_hint=tm)
    wx = out[:, :N].reshape(B, T, N)
    # TODO(synk): original forward returns undefined `w` (NameError); returning softmax(lw) instead.
    return wx, weights


if __name__ == "__main__":
    key = jax.random.PRNGKey(0)
    # small shapes: batch=2, seq=8, hidden=32 (!= 768 -> 25 layer weights), n_neurons=24
    B, T, D, L, N = 2, 8, 32, 25, 24
    kx, kw, kb = jax.random.split(key, 3)

    x = jax.random.normal(kx, (B, T, D, L), dtype=jnp.float32)
    # parameters, initialized deterministically (mirrors nn.Linear / Parameter(ones))
    lw = jnp.ones((L,), dtype=jnp.float32)
    bound = 1.0 / jnp.sqrt(jnp.float32(D))
    W = jax.random.uniform(kw, (N, D), minval=-bound, maxval=bound, dtype=jnp.float32)
    b = jax.random.uniform(kb, (N,), minval=-bound, maxval=bound, dtype=jnp.float32)

    # weight_sum=True path (layer-weighted mix folded into the GEMM weight)
    wx, w_mix = probe_forward(x, lw, W, b, weight_sum=True)
    jax.block_until_ready((wx, w_mix))

    weights_ref = jax.nn.softmax(lw)
    x_mixed = jnp.einsum("btdl,l->btd", x, weights_ref)
    ref = jnp.einsum("btd,nd->btn", x_mixed, W) + b
    assert wx.shape == (B, T, N)
    assert jnp.allclose(wx, ref, atol=1e-4, rtol=1e-4)
    assert jnp.allclose(w_mix, weights_ref, atol=1e-6, rtol=1e-6)

    # weight_sum=False path (last layer sliced in the wrapper, K = D GEMM)
    wx2, _ = probe_forward(x, lw, W, b, weight_sum=False)
    jax.block_until_ready(wx2)
    ref2 = jnp.einsum("btd,nd->btn", x[..., -1], W) + b
    assert jnp.allclose(wx2, ref2, atol=1e-4, rtol=1e-4)

    print("KERNEL_OK")
</pallas_src>

<mosaic_0001>
module attributes {stable_mosaic.version = 11 : i64} {
  func.func @_probe_kernel_resident(%arg0: i32, %arg1: memref<8x800xf32, #tpu.memory_space<vmem>>, %arg2: memref<800x128xf32, #tpu.memory_space<vmem>>, %arg3: memref<1x128xf32, #tpu.memory_space<vmem>>, %arg4: memref<8x128xf32, #tpu.memory_space<vmem>>) attributes {dimension_semantics = [#tpu.dimension_semantics<parallel>], iteration_bounds = array<i64: 2>, scalar_prefetch = 0 : i64, scratch_operands = 0 : i64, tpu.core_type = #tpu.core_type<tc>, window_params = [{transform_indices = @transform_0, window_bounds = array<i64: 8, 800>}, {pipeline_mode = #tpu.pipeline_mode<synchronous>, transform_indices = @transform_1, window_bounds = array<i64: 800, 128>}, {pipeline_mode = #tpu.pipeline_mode<synchronous>, transform_indices = @transform_2, window_bounds = array<i64: 1, 128>}, {transform_indices = @transform_3, window_bounds = array<i64: 8, 128>}]} {
    %c0 = arith.constant 0 : index
    %c0_0 = arith.constant 0 : index
    %0 = vector.load %arg1[%c0, %c0_0] : memref<8x800xf32, #tpu.memory_space<vmem>>, vector<8x800xf32>
    %c0_1 = arith.constant 0 : index
    %c0_2 = arith.constant 0 : index
    %1 = vector.load %arg2[%c0_1, %c0_2] : memref<800x128xf32, #tpu.memory_space<vmem>>, vector<800x128xf32>
    %cst = arith.constant dense<0.000000e+00> : vector<8x128xf32>
    %2 = tpu.matmul %0, %1, %cst {dimension_numbers = #tpu.dot_dimension_numbers<[1], [0], [0], [1], [0, 0, 1, 1], [], []>} : vector<8x800xf32>, vector<800x128xf32>, vector<8x128xf32> -> vector<8x128xf32>
    %c0_3 = arith.constant 0 : index
    %c0_4 = arith.constant 0 : index
    %3 = vector.load %arg3[%c0_3, %c0_4] : memref<1x128xf32, #tpu.memory_space<vmem>>, vector<1x128xf32>
    %4 = vector.broadcast %3 : vector<1x128xf32> to vector<8x128xf32>
    %5 = arith.addf %2, %4 : vector<8x128xf32>
    %c0_5 = arith.constant 0 : index
    %c0_6 = arith.constant 0 : index
    %6 = vector.load %arg4[%c0_5, %c0_6] : memref<8x128xf32, #tpu.memory_space<vmem>>, vector<8x128xf32>
    tpu.vector_store %arg4[%c0_5, %c0_6], %5 {strides = array<i32>} : memref<8x128xf32, #tpu.memory_space<vmem>>, vector<8x128xf32>,
    return
  }
  func.func @transform_0(%arg0: i32) -> (i32, i32) {
    %c0_i32 = arith.constant 0 : i32
    %c0_i32_0 = arith.constant 0 : i32
    return %arg0, %c0_i32 : i32, i32
  }
  func.func @transform_1(%arg0: i32) -> (i32, i32) {
    %c0_i32 = arith.constant 0 : i32
    %c0_i32_0 = arith.constant 0 : i32
    %c0_i32_1 = arith.constant 0 : i32
    return %c0_i32, %c0_i32_0 : i32, i32
  }
  func.func @transform_2(%arg0: i32) -> (i32, i32) {
    %c0_i32 = arith.constant 0 : i32
    %c0_i32_0 = arith.constant 0 : i32
    %c0_i32_1 = arith.constant 0 : i32
    return %c0_i32, %c0_i32_0 : i32, i32
  }
  func.func @transform_3(%arg0: i32) -> (i32, i32) {
    %c0_i32 = arith.constant 0 : i32
    %c0_i32_0 = arith.constant 0 : i32
    return %arg0, %c0_i32 : i32, i32
  }
}

</mosaic_0001>

<bundles_post_ra>
// kernel: tpu_custom_call.1
= control target key start
LH: loop header
LB: loop body
LE: loop exit
PB: predicated region body
PF: predicated region fallthrough
CT: control target
= control target key end

     0   :  { %8 = vsyncpa [#allocation3], 0  ;;  %s1364_s0 = inlined_call_operand.hbm [shape: f32[16,800], index: 0, kind: input, shape index: {}]   ;;  %s1365_s1 = inlined_call_operand.hbm [shape: f32[800,128], index: 1, kind: input, shape index: {}]   ;;  %s1366_s2 = inlined_call_operand.vmem [shape: f32[1,128], index: 2, kind: input, shape index: {}]   ;;  %s1367_s3 = inlined_call_operand.hbm [shape: f32[16,128], index: 3, kind: output, shape index: {}]  }
   0x1   :  { %10 = vsyncpa [#allocation3 + $0x1], 0 }
   0x2   :  { %11 = vsyncpa [#allocation6], 0 }
   0x3   :  { %12 = vsyncpa [#allocation4], 0 }
   0x4   :  { %14 = vsyncpa [#allocation4 + $0x1], 0  ;;  %s1155_s12 = smov 0   ;;  %s1157_s13 = smov 0  }
   0x5   :  { %s1159_s14 = smov 0   ;;  %s1161_s15 = smov 0  }
   0x6 LB: > { %s1176_s16 = sadd.s32 4294967295, %s1125_s15   ;;  %s695_s17 = sadd.s32 4294967294, %s1125_s15   ;;  %s1125_s15 = sphi %s1161_s15, %s1387_s15   ;;  %s1121_s14 = sphi %s1159_s14, %s1386_s14   ;;  %s1117_s13 = sphi %s1157_s13, %s1385_s13   ;;  %s1113_s12 = sphi %s1155_s12, %s1384_s12  }
   0x7   : > { %p40_p0 = scmp.ne.s32.totalorder %s1117_s13, %s1113_s12  ;;  %p1368_p1 = scmp.eq.s32.totalorder %s1176_s16, 0 }
   0x8   : > { %p112_p3 = scmp.eq.s32.totalorder %s695_s17, 1  ;;  %p696_p5 = scmp.ge.s32.totalorder %s1125_s15, 1 }
   0x9   : > { %p1185_p4 = por %p1368_p1, %p40_p0  ;;  %p119_p7 = scmp.lt.s32.totalorder %s1125_s15, 3 }
   0xa   : > { %p1190_p6 = por %p112_p3, %p40_p0  ;;  %s1127_s21 = smov [#allocation5]  }
   0xb   : > { %s1371_s18 = scalar_select %p1185_p4, 1, 0 }
   0xc   : > { %s1372_s19 = scalar_select %p1190_p6, 1, 0 }
   0xd   : > { %p1195_p8 = pnand %p696_p5, %p119_p7  ;;  %s131_s22 = sshll.u32 %s1127_s21, 4  ;;  %s1199_s22 = int_to_ptr.vmem [resolvable:$true] %s131_s22 }
   0xe   : > { %s1211_s24 = sadd.s32 1, %s1125_s15   ;;  %s27_s25 = sadd.s32 1, %s1121_s14 }
   0xf   : > { %s1373_s20 = scalar_select %p1195_p8, 1, 0 }
  0x10   : > { %p943_p9 = pneg %p1195_p8  ;;  %s24_s26 = ssub.s32 %s1125_s15, %s1211_s24 }
  0x11   : > { %s997_s29 = scalar_lea.hbm %s1365_s1, 12800 }
  0x12   : > { %p1206_p11 = pnand %p943_p9, %p1368_p1  ;;  %p998_p12 = scmp.ne.s32.totalorder %s1365_s1, %s997_s29 }
  0x13   : > { %p1004_p5 = scmp.lt.u32.totalorder %s997_s29, %s1365_s1 }
  0x14   : > { %p999_p13 = pneg %p1206_p11 }
  0x16   : > { %p1000_p0 = pnand %p999_p13, %p998_p12 }
  0x18   : > { %p1001_p3 = pneg %p1000_p0 }
  0x1a   : > { %p1006_p7 = pnand %p1004_p5, %p1001_p3 }
  0x1c   : > { %1009 = shalt.err (!%p1006_p7)
}
  0x1d   : > { %s1010_s7 = scalar_lea.vmem %s1199_s22, 12800  ;;  %p1018_p2 = scmp.lt.s32.totalorder %s1199_s22, %s1199_s22 }
  0x1e   : > { %p1011_p9 = scmp.ne.s32.totalorder %s1199_s22, %s1010_s7  ;;  %p1019_p6 = scmp.lt.s32.totalorder %s1010_s7, %s1010_s7 }
  0x20   : > { %p1013_p10 = pnand %p1011_p9, %p999_p13  ;;  %p1020_p4 = por %p1019_p6, %p1018_p2 }
  0x22   : > { %p1014_p1 = pneg %p1013_p10 }
  0x24   : > { %p1021_p8 = pnand %p1020_p4, %p1014_p1 }
  0x26   : > { %1024 = shalt.err (!%p1021_p8)
}
  0x27   : > { %s1128_s8 = smov 128   ;;  %s1129_s9 = smov 8  }
  0x28   : > { %946 = dma.hbm_to_vmem [thread:$0]  (!%p1206_p11), %s1365_s1, 12800, %s1199_s22, [#allocation6], %s1128_s8, %s1128_s8, %s1129_s9  }
  0x29   : > { %p25_p2 = scmp.eq.s32.totalorder %s24_s26, 0  ;;  %p34_p1 = scmp.ne.s32.totalorder %s1121_s14, %s1117_s13 }
  0x2a   : > { %p35_p4 = scmp.eq.s32.totalorder %s1125_s15, 0  ;;  %p956_p6 = scmp.lt.s32.totalorder %s1125_s15, 2 }
  0x2b   : > { %s1242_s17 = scalar_select %p25_p2, %s1121_s14, %s27_s25  }
  0x2c   : > { %p36_p8 = por %p35_p4, %p34_p1  ;;  %p1375_p10 = scmp.eq.s32.totalorder %s1176_s16, 1 }
  0x2d   : > { %s148_s27 = sand.u32 1, %s1121_s14   ;;  %s933_s28 = smul.u32 896, %s1125_s15 }
  0x2e   : > { %p1246_p12 = por %p1375_p10, %p34_p1  ;;  %s932_s29 = smul.u32 56, %s148_s27 }
  0x2f   : > { %p1252_p13 = pnand %p956_p6, %p36_p8  ;;  %s1259_s25 = scalar_lea.hbm %s1364_s0, %s933_s28 }
  0x30   : > { %s152_s30 = scalar_lea.vmem [#allocation2], %s932_s29  ;;  %s149_s5 = scalar_lea.sflag [#allocation3], %s148_s27 }
  0x31   : > { %s160_s4 = sshll.u32 %s152_s30, 4  ;;  %s1025_s6 = scalar_lea.hbm %s1259_s25, 896  ;;  %s1261_s4 = int_to_ptr.vmem [resolvable:$true] %s160_s4 }
  0x32   : > { %p1026_p11 = scmp.ne.s32.totalorder %s1259_s25, %s1025_s6  ;;  %p1027_p0 = pneg %p1252_p13 }
  0x33   : > { %s1030_s9 = scalar_lea.hbm %s1364_s0, 1792  ;;  %p1031_p7 = scmp.lt.u32.totalorder %s1259_s25, %s1364_s0 }
  0x34   : > { %p1028_p3 = pnand %p1027_p0, %p1026_p11  ;;  %p1032_p9 = scmp.lt.u32.totalorder %s1030_s9, %s1025_s6 }
  0x35   : > { %p1034_p1 = scmp.lt.u32.totalorder %s1025_s6, %s1259_s25 }
  0x36   : > { %p1029_p5 = pneg %p1028_p3  ;;  %p1033_p2 = por %p1032_p9, %p1031_p7 }
  0x38   : > { %p1035_p4 = por %p1034_p1, %p1033_p2 }
  0x3a   : > { %p1036_p6 = pnand %p1035_p4, %p1029_p5 }
  0x3c   : > { %1039 = shalt.err (!%p1036_p6)
}
  0x3d   : > { %s1040_s27 = scalar_lea.vmem %s1261_s4, 896  ;;  %s1130_s28 = smov [#allocation2]  }
  0x3e   : > { %p1041_p8 = scmp.ne.s32.totalorder %s1261_s4, %s1040_s27  ;;  %s1045_s29 = sshll.u32 %s1130_s28, 4  ;;  %s1046_s29 = int_to_ptr.vmem [resolvable:$false] %s1045_s29 }
  0x3f   : > { %s1047_s22 = scalar_lea.vmem %s1046_s29, 1792  ;;  %p1048_p3 = scmp.lt.s32.totalorder %s1261_s4, %s1046_s29 }
  0x40   : > { %p1043_p10 = pnand %p1041_p8, %p1027_p0  ;;  %p1049_p7 = scmp.lt.s32.totalorder %s1047_s22, %s1040_s27 }
  0x42   : > { %p1044_p11 = pneg %p1043_p10  ;;  %p1050_p9 = por %p1049_p7, %p1048_p3 }
  0x44   : > { %p1051_p2 = pnand %p1050_p9, %p1044_p11 }
  0x46   : > { %1054 = shalt.err (!%p1051_p2)
}
  0x47   : > { %950 = dma.hbm_to_vmem [thread:$0]  (!%p1252_p13), %s1259_s25, 896, %s1261_s4, %s149_s5  }
  0x48   : > { %p1378_p5 = scmp.ne.s32.totalorder %s1373_s20, 0 }
  0x49   : > { %s1291_s26 = sand.u32 (!%p1378_p5), 1, %s1117_s13   ;;  %p1379_p0 = scmp.ne.s32.totalorder (!%p1378_p5), %s1371_s18, 0 }
  0x4a   : > { %169 = sbr.rel (%p1378_p5) target bundleno = 385 (0x181), region = 32  ;;  %s172_s6 = scalar_lea.sflag (!%p1378_p5), [#allocation3], %s1291_s26 }
  0x4b   : > { %s934_s30 = smul.u32 (!%p1378_p5), 56, %s1291_s26 }
  0x4d   : > { %s1295_s7 = scalar_lea.vmem (!%p1378_p5), [#allocation2], %s934_s30 }
  0x51   : > { %1100 = dma.done.wait (%p1379_p0), %s172_s6, 896  }
  0x52   : > { %1102 = vsyncadd (%p1379_p0), %s172_s6, 4294966400  ;;  %p1380_p13 = scmp.eq.s32.totalorder %s1176_s16, 0 }
  0x54   : > { %1104 = dma.done.wait (%p1380_p13), [#allocation6], 12800   ;;  %p1381_p1 = pmov %p1380_p13 }
  0x55   : > { %v225_v0 = vld [vmem:[#allocation5 + $0x80] sm:$0xff]  ;;  %v226_v1 = vld [vmem:[#allocation5 + $0x88] sm:$0xff]  ;;  %v227_v11 = vld [vmem:[#allocation5 + $0x90] sm:$0xff]  ;;  %vm1132_vm0 = vmmov 0   ;;  %vm316_vm1 = vcmask 261120   ;;  %s702_s23 = sshll.u32 %s1291_s26, 3 }
  0x56   : > { %1106 = vsyncadd (%p1381_p1), [#allocation6], 4294954496  ;;  %v209_v2 = vld [vmem:[#allocation5] sm:$0xff]  ;;  %v830_v3 = vpack.c.bf16 %v226_v1, %v225_v0  ;;  %v210_v4 = vld [vmem:[#allocation5 + $0x8] sm:$0xff]  ;;  %s706_s25 = sshll.u32 %s1176_s16, 7  ;;  %s201_s4 = scalar_lea.vmem [#allocation7], %s702_s23 }
  0x57   : > { %v257_v5 = vld [vmem:[#allocation5 + $0x180] sm:$0xff]  ;;  %v258_v6 = vld [vmem:[#allocation5 + $0x188] sm:$0xff]  ;;  %v832_v7 = vpack.c.bf16 %v210_v4, %v209_v2  ;;  %v228_v13 = vld [vmem:[#allocation5 + $0x98] sm:$0xff]  ;;  %s615_s5 = sshll.u32 %s201_s4, 4  ;;  %s1320_s10 = scalar_lea.hbm %s1367_s3, %s706_s25  ;;  %s1322_s5 = int_to_ptr.vmem [resolvable:$true] %s615_s5 }
  0x58   : > { %v862_v8 = vpack.c.bf16 %v258_v6, %v257_v5  ;;  %v241_v9 = vld [vmem:[#allocation5 + $0x100] sm:$0xff]  ;;  %v242_v10 = vld [vmem:[#allocation5 + $0x108] sm:$0xff]  ;;  %831 = vmatprep.subr.bf16.mxu0 %v830_v3  ;;  %v211_v14 = vld [vmem:[#allocation5 + $0x10] sm:$0xff]  ;;  %v834_v16 = vpack.c.bf16 %v228_v13, %v227_v11  ;;  %s602_s11 = scalar_lea.sflag [#allocation4], %s1291_s26  ;;  %s1055_s27 = scalar_lea.vmem %s1322_s5, 128 }
  0x59   : > { %v864_v12 = vpack.c.bf16 %v242_v10, %v241_v9  ;;  %v212_v15 = vld [vmem:[#allocation5 + $0x18] sm:$0xff]  ;;  %833 = vmatpush3.bf16.msra.mxu0 %v832_v7  ;;  %v259_v18 = vld [vmem:[#allocation5 + $0x190] sm:$0xff]  ;;  %v229_v23 = vld [vmem:[#allocation5 + $0xa0] sm:$0xff]  ;;  %p1056_p4 = scmp.ne.s32.totalorder %s1322_s5, %s1055_s27  ;;  %s1134_s16 = smov [#allocation7]  }
  0x5a   : > { %863 = vmatprep.subr.bf16.mxu1 %v862_v8  ;;  %v836_v17 = vpack.c.bf16 %v212_v15, %v211_v14  ;;  %v260_v19 = vld [vmem:[#allocation5 + $0x198] sm:$0xff]  ;;  %v243_v20 = vld [vmem:[#allocation5 + $0x110] sm:$0xff]  ;;  %v230_v24 = vld [vmem:[#allocation5 + $0xa8] sm:$0xff]  ;;  %835 = vmatprep.subr.bf16.mxu0 %v834_v16  ;;  %s1059_s28 = sshll.u32 %s1134_s16, 4  ;;  %s1060_s28 = int_to_ptr.vmem [resolvable:$false] %s1059_s28 }
  0x5b   : > { %865 = vmatpush3.bf16.msra.mxu1 %v864_v12  ;;  %v866_v21 = vpack.c.bf16 %v260_v19, %v259_v18  ;;  %v244_v22 = vld [vmem:[#allocation5 + $0x118] sm:$0xff]  ;;  %v838_v26 = vpack.c.bf16 %v230_v24, %v229_v23  ;;  %v213_v27 = vld [vmem:[#allocation5 + $0x20] sm:$0xff]  ;;  %v214_v28 = vld [vmem:[#allocation5 + $0x28] sm:$0xff]  ;;  %p1057_p6 = pnand %p1056_p4, %p1246_p12  ;;  %s1061_s29 = scalar_lea.vmem %s1060_s28, 256 }
  0x5c   : > { %v868_v25 = vpack.c.bf16 %v244_v22, %v243_v20  ;;  %v261_v29 = vld [vmem:[#allocation5 + $0x1a0] sm:$0xff]  ;;  %v262_v30 = vld [vmem:[#allocation5 + $0x1a8] sm:$0xff]  ;;  %v840_v33 = vpack.c.bf16 %v214_v28, %v213_v27  ;;  %v231_v35 = vld [vmem:[#allocation5 + $0xb0] sm:$0xff]  ;;  %p1062_p10 = scmp.lt.s32.totalorder %s1322_s5, %s1060_s28  ;;  %p1063_p11 = scmp.lt.s32.totalorder %s1061_s29, %s1055_s27 }
  0x5d   : > { %867 = vmatprep.subr.bf16.mxu1 %v866_v21  ;;  %v245_v31 = vld [vmem:[#allocation5 + $0x120] sm:$0xff]  ;;  %v246_v32 = vld [vmem:[#allocation5 + $0x128] sm:$0xff]  ;;  %837 = vmatpush3.bf16.msra.mxu0 %v836_v17  ;;  %v870_v34 = vpack.c.bf16 %v262_v30, %v261_v29  ;;  %v232_v36 = vld [vmem:[#allocation5 + $0xb8] sm:$0xff]  ;;  %p1058_p8 = pneg %p1057_p6 }
  0x5e   : > { %v215_v37 = vld [vmem:[#allocation5 + $0x30] sm:$0xff]  ;;  %839 = vmatprep.subr.bf16.mxu0 %v838_v26  ;;  %v872_v38 = vpack.c.bf16 %v246_v32, %v245_v31  ;;  %v842_v39 = vpack.c.bf16 %v232_v36, %v231_v35  ;;  %v216_v40 = vld [vmem:[#allocation5 + $0x38] sm:$0xff]  ;;  %v233_v46 = vld [vmem:[#allocation5 + $0xc0] sm:$0xff]  ;;  %p1064_p3 = por %p1063_p11, %p1062_p10 }
  0x5f   : > { %869 = vmatpush3.bf16.msra.mxu1 %v868_v25  ;;  %v263_v41 = vld [vmem:[#allocation5 + $0x1b0] sm:$0xff]  ;;  %v264_v42 = vld [vmem:[#allocation5 + $0x1b8] sm:$0xff]  ;;  %v234_v47 = vld [vmem:[#allocation5 + $0xc8] sm:$0xff]  ;;  %v844_v48 = vpack.c.bf16 %v216_v40, %v215_v37 }
  0x60   : > { %871 = vmatprep.subr.bf16.mxu1 %v870_v34  ;;  %v874_v43 = vpack.c.bf16 %v264_v42, %v263_v41  ;;  %v247_v44 = vld [vmem:[#allocation5 + $0x130] sm:$0xff]  ;;  %v248_v45 = vld [vmem:[#allocation5 + $0x138] sm:$0xff]  ;;  %v265_v49 = vld [vmem:[#allocation5 + $0x1c0] sm:$0xff]  ;;  %v846_v52 = vpack.c.bf16 %v234_v47, %v233_v46  ;;  %p1065_p7 = pnand %p1064_p3, %p1058_p8 }
  0x61   : > { %841 = vmatpush3.bf16.msra.mxu0 %v840_v33  ;;  %v266_v50 = vld [vmem:[#allocation5 + $0x1c8] sm:$0xff]  ;;  %v876_v51 = vpack.c.bf16 %v248_v45, %v247_v44  ;;  %v217_v53 = vld [vmem:[#allocation5 + $0x40] sm:$0xff]  ;;  %v235_v58 = vld [vmem:[#allocation5 + $0xd0] sm:$0xff] }
  0x62   : > { %843 = vmatprep.subr.bf16.mxu0 %v842_v39  ;;  %v218_v54 = vld [vmem:[#allocation5 + $0x48] sm:$0xff]  ;;  %v249_v55 = vld [vmem:[#allocation5 + $0x140] sm:$0xff]  ;;  %v878_v56 = vpack.c.bf16 %v266_v50, %v265_v49  ;;  %v236_v59 = vld [vmem:[#allocation5 + $0xd8] sm:$0xff] }
  0x63   : > { %873 = vmatpush3.bf16.msra.mxu1 %v872_v38  ;;  %v250_v57 = vld [vmem:[#allocation5 + $0x148] sm:$0xff]  ;;  %v267_v60 = vld [vmem:[#allocation5 + $0x1d0] sm:$0xff]  ;;  %v268_v61 = vld [vmem:[#allocation5 + $0x1d8] sm:$0xff]  ;;  %v848_v62 = vpack.c.bf16 %v218_v54, %v217_v53  ;;  %v850_v0 = vpack.c.bf16 %v236_v59, %v235_v58 }
  0x64   : > { %875 = vmatprep.subr.bf16.mxu1 %v874_v43  ;;  %v880_v63 = vpack.c.bf16 %v250_v57, %v249_v55  ;;  %v219_v1 = vld [vmem:[#allocation5 + $0x50] sm:$0xff]  ;;  %v220_v2 = vld [vmem:[#allocation5 + $0x58] sm:$0xff]  ;;  %v882_v4 = vpack.c.bf16 %v268_v61, %v267_v60  ;;  %v237_v6 = vld [vmem:[#allocation5 + $0xe0] sm:$0xff] }
  0x65   : > { %845 = vmatpush3.bf16.msra.mxu0 %v844_v48  ;;  %v251_v3 = vld [vmem:[#allocation5 + $0x150] sm:$0xff]  ;;  %v252_v5 = vld [vmem:[#allocation5 + $0x158] sm:$0xff]  ;;  %v238_v7 = vld [vmem:[#allocation5 + $0xe8] sm:$0xff]  ;;  %v852_v10 = vpack.c.bf16 %v220_v2, %v219_v1 }
  0x66   : > { %847 = vmatprep.subr.bf16.mxu0 %v846_v52  ;;  %v269_v8 = vld [vmem:[#allocation5 + $0x1e0] sm:$0xff]  ;;  %v270_v9 = vld [vmem:[#allocation5 + $0x1e8] sm:$0xff]  ;;  %v203_v12 = vld [vmem:[%s1295_s7 + $0x8] sm:$0xff]  ;;  %v884_v13 = vpack.c.bf16 %v252_v5, %v251_v3  ;;  %v854_v14 = vpack.c.bf16 %v238_v7, %v237_v6 }
  0x67   : > { %877 = vmatpush3.bf16.msra.mxu1 %v876_v51  ;;  %v221_v11 = vld [vmem:[#allocation5 + $0x60] sm:$0xff]  ;;  %v222_v15 = vld [vmem:[#allocation5 + $0x68] sm:$0xff]  ;;  %v886_v18 = vpack.c.bf16 %v270_v9, %v269_v8  ;;  %v239_v19 = vld [vmem:[#allocation5 + $0xf0] sm:$0xff]  ;;  %384 = vmatprep.mubr.f32.mxu0 %v203_v12  ;;  %v1131_v51 = vmov 0.0|0.0  }
  0x68   : > { %879 = vmatprep.subr.bf16.mxu1 %v878_v56  ;;  %v253_v16 = vld [vmem:[#allocation5 + $0x160] sm:$0xff]  ;;  %v254_v17 = vld [vmem:[#allocation5 + $0x168] sm:$0xff]  ;;  %v240_v20 = vld [vmem:[#allocation5 + $0xf8] sm:$0xff]  ;;  %v856_v24 = vpack.c.bf16 %v222_v15, %v221_v11 }
  0x69   : > { %849 = vmatpush3.bf16.msra.mxu0 %v848_v62  ;;  %v205_v21 = vld [vmem:[%s1295_s7 + $0x18] sm:$0xff]  ;;  %v271_v22 = vld [vmem:[#allocation5 + $0x1f0] sm:$0xff]  ;;  %v272_v23 = vld [vmem:[#allocation5 + $0x1f8] sm:$0xff]  ;;  %v888_v25 = vpack.c.bf16 %v254_v17, %v253_v16  ;;  %v858_v26 = vpack.c.bf16 %v240_v20, %v239_v19 }
  0x6a   : > { %851 = vmatprep.subr.bf16.mxu0 %v850_v0  ;;  %454 = vmatprep.mubr.f32.mxu1 %v205_v21  ;;  %v223_v27 = vld [vmem:[#allocation5 + $0x70] sm:$0xff]  ;;  %v224_v28 = vld [vmem:[#allocation5 + $0x78] sm:$0xff]  ;;  %v890_v30 = vpack.c.bf16 %v272_v23, %v271_v22  ;;  %v289_v32 = vld [vmem:[#allocation5 + $0x280] sm:$0xff] }
  0x6b   : > { %881 = vmatpush3.bf16.msra.mxu1 %v880_v63  ;;  %v255_v29 = vld [vmem:[#allocation5 + $0x170] sm:$0xff]  ;;  %v256_v31 = vld [vmem:[#allocation5 + $0x178] sm:$0xff]  ;;  %v290_v33 = vld [vmem:[#allocation5 + $0x288] sm:$0xff]  ;;  %v860_v34 = vpack.c.bf16 %v224_v28, %v223_v27  ;;  %v1133_v63 = vmov 0.0  }
  0x6c   : > { %883 = vmatprep.subr.bf16.mxu1 %v882_v4  ;;  %v892_v35 = vpack.c.bf16 %v256_v31, %v255_v29  ;;  %v894_v36 = vpack.c.bf16 %v290_v33, %v289_v32  ;;  %v273_v37 = vld [vmem:[#allocation5 + $0x200] sm:$0xff]  ;;  %v274_v38 = vld [vmem:[#allocation5 + $0x208] sm:$0xff]  ;;  %v291_v39 = vld [vmem:[#allocation5 + $0x290] sm:$0xff] }
  0x6d   : > { %853 = vmatpush3.bf16.msra.mxu0 %v852_v10  ;;  %v292_v40 = vld [vmem:[#allocation5 + $0x298] sm:$0xff]  ;;  %v202_v41 = vld [vmem:[%s1295_s7] sm:$0xff]  ;;  %v896_v42 = vpack.c.bf16 %v274_v38, %v273_v37  ;;  %v305_v47 = vld [vmem:[#allocation5 + $0x300] sm:$0xff] }
  0x6e   : > { %855 = vmatprep.subr.bf16.mxu0 %v854_v14  ;;  %v204_v43 = vld [vmem:[%s1295_s7 + $0x10] sm:$0xff]  ;;  %v275_v44 = vld [vmem:[#allocation5 + $0x210] sm:$0xff]  ;;  %v898_v45 = vpack.c.bf16 %v292_v40, %v291_v39  ;;  %v306_v48 = vld [vmem:[#allocation5 + $0x308] sm:$0xff] }
  0x6f   : > { %885 = vmatpush3.bf16.msra.mxu1 %v884_v13  ;;  %v276_v46 = vld [vmem:[#allocation5 + $0x218] sm:$0xff]  ;;  %v293_v49 = vld [vmem:[#allocation5 + $0x2a0] sm:$0xff]  ;;  %v294_v50 = vld [vmem:[#allocation5 + $0x2a8] sm:$0xff]  ;;  %v927_v52 = vpack.c.bf16 %v306_v48, %v305_v47 }
  0x70   : > { %887 = vmatprep.subr.bf16.mxu1 %v886_v18  ;;  %v307_v53 = vld [vmem:[#allocation5 + $0x310] sm:$0xff]  ;;  %v308_v55 = vld [vmem:[#allocation5 + $0x318] sm:$0xff]  ;;  %v900_v56 = vpack.c.bf16 %v276_v46, %v275_v44  ;;  %v902_v57 = vpack.c.bf16 %v294_v50, %v293_v49  ;;  %v277_v58 = vld [vmem:[#allocation5 + $0x220] sm:$0xff] }
  0x71   : > { %857 = vmatpush3.bf16.msra.mxu0 %v856_v24  ;;  %v207_v54 = vld [vmem:[%s1295_s7 + $0x28] sm:$0xff]  ;;  %v278_v59 = vld [vmem:[#allocation5 + $0x228] sm:$0xff]  ;;  %v930_v60 = vpack.c.bf16 %v308_v55, %v307_v53  ;;  %v208_v4 = vld [vmem:[%s1295_s7 + $0x30] sm:$0xff] }
  0x72   : > { %859 = vmatprep.subr.bf16.mxu0 %v858_v26  ;;  %v295_v61 = vld [vmem:[#allocation5 + $0x2b0] sm:$0xff]  ;;  %v296_v62 = vld [vmem:[#allocation5 + $0x2b8] sm:$0xff]  ;;  %v904_v0 = vpack.c.bf16 %v278_v59, %v277_v58  ;;  %v297_v5 = vld [vmem:[#allocation5 + $0x2c0] sm:$0xff] }
  0x73   : > { %889 = vmatpush3.bf16.msra.mxu1 %v888_v25  ;;  %v906_v1 = vpack.c.bf16 %v296_v62, %v295_v61  ;;  %v279_v2 = vld [vmem:[#allocation5 + $0x230] sm:$0xff]  ;;  %v280_v3 = vld [vmem:[#allocation5 + $0x238] sm:$0xff]  ;;  %v298_v6 = vld [vmem:[#allocation5 + $0x2c8] sm:$0xff] }
  0x74   : > { %891 = vmatprep.subr.bf16.mxu1 %v890_v30  ;;  %v908_v7 = vpack.c.bf16 %v280_v3, %v279_v2  ;;  %v910_v8 = vpack.c.bf16 %v298_v6, %v297_v5  ;;  %v281_v9 = vld [vmem:[#allocation5 + $0x240] sm:$0xff]  ;;  %v282_v10 = vld [vmem:[#allocation5 + $0x248] sm:$0xff]  ;;  %v299_v11 = vld [vmem:[#allocation5 + $0x2d0] sm:$0xff] }
  0x75   : > { %861 = vmatpush3.bf16.msra.mxu0 %v860_v34  ;;  %v300_v12 = vld [vmem:[#allocation5 + $0x2d8] sm:$0xff]  ;;  %v912_v13 = vpack.c.bf16 %v282_v10, %v281_v9  ;;  %v283_v15 = vld [vmem:[#allocation5 + $0x250] sm:$0xff]  ;;  %v301_v17 = vld [vmem:[#allocation5 + $0x2e0] sm:$0xff] }
  0x76   : > { %895 = vmatprep.subr.bf16.mxu0 %v894_v36  ;;  %v914_v14 = vpack.c.bf16 %v300_v12, %v299_v11  ;;  %v284_v16 = vld [vmem:[#allocation5 + $0x258] sm:$0xff]  ;;  %v302_v18 = vld [vmem:[#allocation5 + $0x2e8] sm:$0xff]  ;;  %v285_v21 = vld [vmem:[#allocation5 + $0x260] sm:$0xff] }
  0x77   : > { %893 = vmatpush3.bf16.msra.mxu1 %v892_v35  ;;  %v916_v19 = vpack.c.bf16 %v284_v16, %v283_v15  ;;  %v918_v20 = vpack.c.bf16 %v302_v18, %v301_v17  ;;  %v286_v22 = vld [vmem:[#allocation5 + $0x268] sm:$0xff]  ;;  %v303_v23 = vld [vmem:[#allocation5 + $0x2f0] sm:$0xff]  ;;  %v304_v24 = vld [vmem:[#allocation5 + $0x2f8] sm:$0xff] }
  0x78   : > { %926 = vmatprep.subr.bf16.mxu1 %v1131_v51  ;;  %385 = vmatmul.mubr.f32.vlgmr.msra.gmra.mrb[0].mxu0 %v202_v41  ;;  %v920_v25 = vpack.c.bf16 %v286_v22, %v285_v21  ;;  %v922_v26 = vpack.c.bf16 %v304_v24, %v303_v23  ;;  %v287_v27 = vld [vmem:[#allocation5 + $0x270] sm:$0xff]  ;;  %v288_v28 = vld [vmem:[#allocation5 + $0x278] sm:$0xff] }
  0x79   : > { %897 = vmatpush3.bf16.msra.mxu0 %v896_v42  ;;  %524 = vmatprep.mubr.f32.mxu0 %v207_v54  ;;  %v924_v29 = vpack.c.bf16 %v288_v28, %v287_v27  ;;  %v206_v30 = vld [vmem:[%s1295_s7 + $0x20] sm:$0xff] }
  0x7a   : > { %455 = vmatmul.mubr.f32.vlgmr.msra.gmra.mrb[0].mxu1 %v204_v43  ;;  %899 = vmatprep.subr.bf16.mxu0 %v898_v45  ;;  %v703_v32 = vld [vmem:[%s1366_s2] ss:$0 sm:$0xff] }
  0x7b   : > { %928 = vmatpush3.bf16.msra.mxu1 %v927_v52  ;;  %827 = vmatprep.mubr.msk.f32.mxu1 %vm1132_vm0, %v1133_v63 }
  0x7c   : > { %929 = vmatprep.subr.bf16.mxu1 %v1131_v51 }
  0x7d   : > { %901 = vmatpush3.bf16.msra.mxu0 %v900_v56 }
  0x7e   : > { %903 = vmatprep.subr.bf16.mxu0 %v902_v57 }
  0x7f   : > { %931 = vmatpush3.bf16.msra.mxu1 %v930_v60 }
  0x81   : > { %905 = vmatpush3.bf16.msra.mxu0 %v904_v0 }
  0x82   : > { %828 = vmatmul.mubr.msk.f32.vlgmr.msra.gmra.mrb[2].mxu1 %vm316_vm1, %v208_v4  ;;  %907 = vmatprep.subr.bf16.mxu0 %v906_v1 }
  0x85   : > { %909 = vmatpush3.bf16.msra.mxu0 %v908_v7 }
  0x86   : > { %911 = vmatprep.subr.bf16.mxu0 %v910_v8 }
  0x89   : > { %913 = vmatpush3.bf16.msra.mxu0 %v912_v13 }
  0x8a   : > { %915 = vmatprep.subr.bf16.mxu0 %v914_v14 }
  0x8d   : > { %917 = vmatpush3.bf16.msra.mxu0 %v916_v19 }
  0x8e   : > { %919 = vmatprep.subr.bf16.mxu0 %v918_v20 }
  0x91   : > { %921 = vmatpush3.bf16.msra.mxu0 %v920_v25 }
  0x92   : > { %923 = vmatprep.subr.bf16.mxu0 %v922_v26 }
  0x95   : > { %925 = vmatpush3.bf16.msra.mxu0 %v924_v29 }
  0x98   : > { %525 = vmatmul.mubr.f32.vlgmr.msra.gmra.mrb[2].mxu0 %v206_v30 }
 0x14b   : > { %v741_v31 = vpop.f32.mrb[0].mxu0 }
 0x14c   : > { %v742_v33 = vpop.f32.mrb[1].mxu0 }
 0x14d   : > { %v776_v34 = vpop.f32.mrb[0].mxu1  ;;  %v743_v35 = vadd.f32 %v742_v33, %v741_v31 }
 0x14e   : > { %v777_v36 = vpop.f32.mrb[1].mxu1 }
 0x14f   : > { %v778_v37 = vadd.f32 %v777_v36, %v776_v34  ;;  %v387_v38 = vadd.f32 %v743_v35, %v703_v32 }
 0x151   : > { %v457_v39 = vadd.f32 %v778_v37, %v387_v38 }
 0x155   : > { %v596_v40 = vpop.f32.mrb[2].mxu1 }
 0x156   : > { %v829_v41 = vpop.f32.mrb[3].mxu1 }
 0x16b   : > { %v811_v42 = vpop.f32.mrb[2].mxu0 }
 0x16c   : > { %v812_v43 = vpop.f32.mrb[3].mxu0 }
 0x16d   : > { %v813_v44 = vadd.f32 %v812_v43, %v811_v42 }
 0x16f   : > { %v527_v45 = vadd.f32 %v813_v44, %v457_v39 }
 0x171   : > { %v597_v46 = vadd.f32 %v596_v40, %v527_v45 }
 0x173   : > { %600 = vst [vmem:[%s201_s4] sm:$0xff] %v597_v46 }
 0x174   : > { %1068 = shalt.err (!%p1065_p7)
}
 0x175   : > { %s1069_s22 = scalar_lea.hbm %s1320_s10, 128  ;;  %s1073_s6 = scalar_lea.hbm %s1367_s3, 256 }
 0x176   : > { %p1070_p9 = scmp.ne.s32.totalorder %s1320_s10, %s1069_s22  ;;  %p1074_p0 = scmp.lt.u32.totalorder %s1320_s10, %s1367_s3 }
 0x177   : > { %p1075_p13 = scmp.lt.u32.totalorder %s1073_s6, %s1069_s22  ;;  %p1077_p4 = scmp.lt.u32.totalorder %s1069_s22, %s1320_s10 }
 0x178   : > { %p1071_p2 = pnand %p1070_p9, %p1246_p12 }
 0x179   : > { %p1076_p1 = por %p1075_p13, %p1074_p0 }
 0x17a   : > { %p1072_p5 = pneg %p1071_p2 }
 0x17b   : > { %p1078_p6 = por %p1077_p4, %p1076_p1 }
 0x17d   : > { %p1079_p8 = pnand %p1078_p6, %p1072_p5 }
 0x17f   : > { %1082 = shalt.err (!%p1079_p8)
}
 0x180   : > { %941 = dma.vmem_to_hbm [thread:$0]  (%p1246_p12), %s1322_s5, 128, %s1320_s10, %s602_s11  }
 0x181 PF: > { %s627_s20 = sand.u32 1, %s1113_s12   ;;  %p1382_p10 = scmp.ne.s32.totalorder %s1372_s19, 0 }
 0x182   : > { %p1383_p11 = scmp.ge.s32.totalorder %s1125_s15, 2  ;;  %s628_s23 = scalar_lea.sflag [#allocation4], %s627_s20 }
 0x184   : > { %p952_p3 = pnand %p1383_p11, %p1382_p10 }
 0x186   : > { %1108 = dma.done.wait (!%p952_p3), %s628_s23, 128  }
 0x187   : > { %1110 = vsyncadd (!%p952_p3), %s628_s23, 4294967168  ;;  %p17_p7 = scmp.ge.s32.totalorder %s1211_s24, 4   ;;  %s1384_s12 = smov %s1117_s13 }
 0x188   : > { %s1385_s13 = smov %s1121_s14  ;;  %s1386_s14 = smov %s1242_s17 }
 0x189   : > { %s1387_s15 = smov %s1211_s24  ;;  %19 = sbr.rel (!%p17_p7) target bundleno = 6 (0x6), region = 81 }
 0x190   :  { %633 = vsyncpa [#allocation3], 1 }
 0x191   :  { %635 = vsyncpa [#allocation3 + $0x1], 1 }
 0x192   :  { %636 = vsyncpa [#allocation6], 1 }
 0x193   :  { %637 = vsyncpa [#allocation4], 1 }
 0x194   :  { %639 = vsyncpa [#allocation4 + $0x1], 1 }

</bundles_post_ra>
